<compile_context>
chip_gen: v7x
topology: tpu7x:2x2x1
jax: 0.10.0
libtpu: 0.0.40
codegen_flags: <defaults>
</compile_context>

<pallas_src>
import jax
import jax.numpy as jnp
from jax import lax
from jax.experimental import pallas as pl
from jax.experimental.pallas import tpu as pltpu


def _make_causal_conv1d_kernel(use_roll):
    """Kernel factory; `use_roll` selects the lane-roll shift (tT % 128 == 0) vs. concat."""

    def kernel(x_ref, w_ref, out_ref, carry_ref):
        # x_ref:     (C_in, tT)      current time tile of one batch (time on lanes)
        # w_ref:     (2, C_out, C_in) stacked taps, w_ref[k] = W[:, :, k]
        # out_ref:   (C_out, tT)
        # carry_ref: (C_in, 1)        last column of the previous time tile (halo)
        j = pl.program_id(1)

        @pl.when(j == 0)
        def _():
            # first time tile of this batch: the causal neighbour of t=0 is zero
            carry_ref[...] = jnp.zeros_like(carry_ref)

        x_tile = x_ref[...]                                   # (C_in, tT)
        c_in, t_tile = x_tile.shape

        prev_col = carry_ref[...]                             # (C_in, 1) halo column
        carry_ref[...] = x_tile[:, t_tile - 1 : t_tile]       # halo for the next time tile

        if use_roll:
            # XLU lane rotation (cheap, separate slot); lane 0 is then fixed up with the halo.
            rolled = pltpu.roll(x_tile, shift=1, axis=1)
            lane = lax.broadcasted_iota(jnp.int32, (c_in, t_tile), 1)
            x_prev = jnp.where(lane == 0, prev_col, rolled)
        else:
            # single full-extent time tile (tT == T): tiny concat, no carry ever consumed
            x_prev = jnp.concatenate([prev_col, x_tile[:, : t_tile - 1]], axis=1)

        y = jnp.dot(w_ref[1], x_tile, preferred_element_type=jnp.float32)
        y = y + jnp.dot(w_ref[0], x_prev, preferred_element_type=jnp.float32)
        out_ref[...] = y.astype(out_ref.dtype)

    return kernel


def _tile_vmem_bytes(c_in, c_out, t_tile, itemsize):
    """Rough working-set estimate for one grid step (double-buffered blocks + scratch)."""
    return (2 * (c_in + c_out) * t_tile * itemsize      # x / out double buffers
            + 2 * 2 * c_out * c_in * itemsize           # stacked weights (double buffer)
            + c_out * t_tile * 4                        # f32 accumulator
            + c_in * 128 * 4)                           # carry scratch (lane-padded)


def causal_conv1d_pallas(x, weight, *, time_tile=1024, compute_dtype=None):
    """x: (B, C_in, T) NCW (PyTorch layout); weight: (C_out, C_in, 2) (torch Conv1d weight).

    Returns (B, C_out, T), identical to CausalConv1d.forward.
    """
    B, C_in, T = x.shape
    C_out, C_in_w, K = weight.shape
    assert C_in_w == C_in and K == 2, "expected torch Conv1d weight (C_out, C_in, 2)"

    out_dtype = x.dtype
    if compute_dtype is None:
        compute_dtype = x.dtype
    itemsize = jnp.dtype(compute_dtype).itemsize

    x_c = x.astype(compute_dtype)                               # no-op when dtypes match
    # stacked taps: w_stk[k] = W[:, :, k]  -> (2, C_out, C_in); single resident operand
    w_stk = jnp.transpose(weight, (2, 0, 1)).astype(compute_dtype)

    # --- time tiling: lane-dense (multiple of 128) unless the whole T fits one tile -----
    if T <= time_tile or T <= 128:
        tT = T                                                  # full extent (always legal)
    else:
        tT = max(128, (min(time_tile, T) // 128) * 128)
    # v7x: keep the per-step working set comfortably inside the 64 MiB/TC VMEM budget
    while tT > 128 and _tile_vmem_bytes(C_in, C_out, tT, itemsize) > 40 * 1024 * 1024:
        tT = max(128, (tT // 2 // 128) * 128)
    n_t = pl.cdiv(T, tT)

    needed = _tile_vmem_bytes(C_in, C_out, tT, itemsize)
    vmem_limit = int(min(max(2 * needed, 32 * 1024 * 1024), 64 * 1024 * 1024))

    kernel = _make_causal_conv1d_kernel(use_roll=(tT % 128 == 0))

    out = pl.pallas_call(
        kernel,
        grid=(B, n_t),
        in_specs=[
            # x, read exactly once; batch dim squeezed, (C_in, tT) block in VMEM
            pl.BlockSpec((None, C_in, tT), lambda b, j: (b, 0, j)),
            # stacked weights, resident across the whole grid
            pl.BlockSpec((2, C_out, C_in), lambda b, j: (0, 0, 0)),
        ],
        out_specs=pl.BlockSpec((None, C_out, tT), lambda b, j: (b, 0, j)),
        out_shape=jax.ShapeDtypeStruct((B, C_out, T), out_dtype),
        scratch_shapes=[pltpu.VMEM((C_in, 1), compute_dtype)],   # halo column carry
        compiler_params=pltpu.CompilerParams(
            dimension_semantics=("parallel", "arbitrary"),       # batch parallel, time sequential
            vmem_limit_bytes=vmem_limit,
        ),
    )(x_c, w_stk)
    return out


def causal_conv1d_reference(x, weight):
    """Pure-JAX reference with the exact PyTorch CausalConv1d semantics (NCW)."""
    x_prev = jnp.pad(x, ((0, 0), (0, 0), (1, 0)))[:, :, :-1]
    return (jnp.einsum("oc,bct->bot", weight[:, :, 0], x_prev)
            + jnp.einsum("oc,bct->bot", weight[:, :, 1], x))


if __name__ == "__main__":
    key = jax.random.PRNGKey(0)
    kx, kw, kx2 = jax.random.split(key, 3)

    # ---- toy shapes consistent with the module ----------------------------------------
    B, C_in, C_out, T = 2, 4, 8, 16
    x = jax.random.normal(kx, (B, C_in, T), jnp.float32)          # NCW like torch
    w = jax.random.normal(kw, (C_out, C_in, 2), jnp.float32)      # Conv1d weight

    ref = causal_conv1d_reference(x, w)

    # single full-extent time tile (concat shift path)
    out = jax.block_until_ready(causal_conv1d_pallas(x, w))
    assert out.shape == (B, C_out, T)
    assert jnp.allclose(out, ref, atol=1e-5, rtol=1e-5)

    # mirror CausalConv1d.init_weights_for_test (all-ones weights)
    w_ones = jnp.ones((C_out, C_in, 2), jnp.float32)
    out_ones = jax.block_until_ready(causal_conv1d_pallas(x, w_ones))
    assert jnp.allclose(out_ones, causal_conv1d_reference(x, w_ones), atol=1e-5, rtol=1e-5)

    # multi-tile path: 128-lane tiles, in-kernel roll shift, halo carry, partial last tile
    T2 = 160
    x2 = jax.random.normal(kx2, (B, C_in, T2), jnp.float32)
    ref2 = causal_conv1d_reference(x2, w)
    out2 = jax.block_until_ready(causal_conv1d_pallas(x2, w, time_tile=128))
    assert out2.shape == (B, C_out, T2)
    assert jnp.allclose(out2, ref2, atol=1e-5, rtol=1e-5)

    # bf16 compute path (halved HBM traffic), f32 accumulation -> looser tolerance
    out_bf16 = jax.block_until_ready(
        causal_conv1d_pallas(x2, w, time_tile=128, compute_dtype=jnp.bfloat16))
    assert jnp.allclose(out_bf16, ref2, atol=1e-1, rtol=5e-2)

    print("KERNEL_OK")
</pallas_src>

<mosaic_0001>
module attributes {stable_mosaic.version = 11 : i64} {
  func.func @kernel(%arg0: i32, %arg1: i32, %arg2: memref<1x4x16xf32, #tpu.memory_space<vmem>>, %arg3: memref<2x8x4xf32, #tpu.memory_space<vmem>>, %arg4: memref<1x8x16xf32, #tpu.memory_space<vmem>>, %arg5: memref<4x1xf32, #tpu.memory_space<vmem>>) attributes {dimension_semantics = [#tpu.dimension_semantics<parallel>, #tpu.dimension_semantics<arbitrary>], iteration_bounds = array<i64: 2, 1>, scalar_prefetch = 0 : i64, scratch_operands = 1 : i64, tpu.core_type = #tpu.core_type<tc>, window_params = [{transform_indices = @transform_0, window_bounds = array<i64: 1, 4, 16>}, {pipeline_mode = #tpu.pipeline_mode<synchronous>, transform_indices = @transform_1, window_bounds = array<i64: 2, 8, 4>}, {transform_indices = @transform_2, window_bounds = array<i64: 1, 8, 16>}]} {
    %c0_i32 = arith.constant 0 : i32
    %0 = arith.cmpi eq, %arg1, %c0_i32 : i32
    %1 = arith.extui %0 : i1 to i32
    %c0_i32_0 = arith.constant 0 : i32
    %2 = arith.cmpi ne, %1, %c0_i32_0 : i32
    scf.if %2 {
      %cst_16 = arith.constant 0.000000e+00 : f32
      %20 = vector.broadcast %cst_16 : f32 to vector<4x1xf32>
      %c0_17 = arith.constant 0 : index
      %c0_18 = arith.constant 0 : index
      %21 = vector.load %arg5[%c0_17, %c0_18] : memref<4x1xf32, #tpu.memory_space<vmem>>, vector<4x1xf32>
      tpu.vector_store %arg5[%c0_17, %c0_18], %20 {strides = array<i32>} : memref<4x1xf32, #tpu.memory_space<vmem>>, vector<4x1xf32>,
    } else {
    }
    %c0 = arith.constant 0 : index
    %c0_1 = arith.constant 0 : index
    %c0_2 = arith.constant 0 : index
    %3 = vector.load %arg2[%c0, %c0_1, %c0_2] : memref<1x4x16xf32, #tpu.memory_space<vmem>>, vector<1x4x16xf32>
    %4 = vector.shape_cast %3 : vector<1x4x16xf32> to vector<4x16xf32>
    %c0_3 = arith.constant 0 : index
    %c0_4 = arith.constant 0 : index
    %5 = vector.load %arg5[%c0_3, %c0_4] : memref<4x1xf32, #tpu.memory_space<vmem>>, vector<4x1xf32>
    %6 = vector.extract_strided_slice %4 {offsets = [0, 15], sizes = [4, 1], strides = [1, 1]} : vector<4x16xf32> to vector<4x1xf32>
    %c0_5 = arith.constant 0 : index
    %c0_6 = arith.constant 0 : index
    %7 = vector.load %arg5[%c0_5, %c0_6] : memref<4x1xf32, #tpu.memory_space<vmem>>, vector<4x1xf32>
    tpu.vector_store %arg5[%c0_5, %c0_6], %6 {strides = array<i32>} : memref<4x1xf32, #tpu.memory_space<vmem>>, vector<4x1xf32>,
    %8 = vector.extract_strided_slice %4 {offsets = [0, 0], sizes = [4, 15], strides = [1, 1]} : vector<4x16xf32> to vector<4x15xf32>
    %9 = tpu.concatenate %5, %8 in 1 : vector<4x1xf32>, vector<4x15xf32> -> vector<4x16xf32>
    %c1 = arith.constant 1 : index
    %c0_7 = arith.constant 0 : index
    %c0_8 = arith.constant 0 : index
    %10 = vector.load %arg3[%c1, %c0_7, %c0_8] : memref<2x8x4xf32, #tpu.memory_space<vmem>>, vector<1x8x4xf32>
    %11 = vector.shape_cast %10 : vector<1x8x4xf32> to vector<8x4xf32>
    %cst = arith.constant dense<0.000000e+00> : vector<8x16xf32>
    %12 = tpu.matmul %11, %4, %cst {dimension_numbers = #tpu.dot_dimension_numbers<[1], [0], [0], [1], [0, 0, 1, 1], [], []>} : vector<8x4xf32>, vector<4x16xf32>, vector<8x16xf32> -> vector<8x16xf32>
    %c0_9 = arith.constant 0 : index
    %c0_10 = arith.constant 0 : index
    %c0_11 = arith.constant 0 : index
    %13 = vector.load %arg3[%c0_9, %c0_10, %c0_11] : memref<2x8x4xf32, #tpu.memory_space<vmem>>, vector<1x8x4xf32>
    %14 = vector.shape_cast %13 : vector<1x8x4xf32> to vector<8x4xf32>
    %cst_12 = arith.constant dense<0.000000e+00> : vector<8x16xf32>
    %15 = tpu.matmul %14, %9, %cst_12 {dimension_numbers = #tpu.dot_dimension_numbers<[1], [0], [0], [1], [0, 0, 1, 1], [], []>} : vector<8x4xf32>, vector<4x16xf32>, vector<8x16xf32> -> vector<8x16xf32>
    %16 = arith.addf %12, %15 : vector<8x16xf32>
    %c0_13 = arith.constant 0 : index
    %c0_14 = arith.constant 0 : index
    %c0_15 = arith.constant 0 : index
    %17 = vector.load %arg4[%c0_13, %c0_14, %c0_15] : memref<1x8x16xf32, #tpu.memory_space<vmem>>, vector<1x8x16xf32>
    %18 = vector.shape_cast %17 : vector<1x8x16xf32> to vector<8x16xf32>
    %19 = vector.shape_cast %16 : vector<8x16xf32> to vector<1x8x16xf32>
    tpu.vector_store %arg4[%c0_13, %c0_14, %c0_15], %19 {strides = array<i32>} : memref<1x8x16xf32, #tpu.memory_space<vmem>>, vector<1x8x16xf32>,
    return
  }
  func.func @transform_0(%arg0: i32, %arg1: i32) -> (i32, i32, i32) {
    %c0_i32 = arith.constant 0 : i32
    %c0_i32_0 = arith.constant 0 : i32
    return %arg0, %c0_i32, %arg1 : i32, i32, i32
  }
  func.func @transform_1(%arg0: i32, %arg1: i32) -> (i32, i32, i32) {
    %c0_i32 = arith.constant 0 : i32
    %c0_i32_0 = arith.constant 0 : i32
    %c0_i32_1 = arith.constant 0 : i32
    %c0_i32_2 = arith.constant 0 : i32
    return %c0_i32, %c0_i32_0, %c0_i32_1 : i32, i32, i32
  }
  func.func @transform_2(%arg0: i32, %arg1: i32) -> (i32, i32, i32) {
    %c0_i32 = arith.constant 0 : i32
    %c0_i32_0 = arith.constant 0 : i32
    return %arg0, %c0_i32, %arg1 : i32, i32, i32
  }
}

</mosaic_0001>

<bundles_post_ra>
// kernel: tpu_custom_call.1
= control target key start
LH: loop header
LB: loop body
LE: loop exit
PB: predicated region body
PF: predicated region fallthrough
CT: control target
= control target key end

     0   :  { %7 = vsyncpa [#allocation4], 0  ;;  %s739_s0 = inlined_call_operand.vmem [shape: f32[2,4,16], index: 0, kind: input, shape index: {}]   ;;  %s740_s1 = inlined_call_operand.vmem [shape: f32[2,8,4], index: 1, kind: input, shape index: {}]   ;;  %s741_s2 = inlined_call_operand.hbm [shape: f32[2,8,16], index: 2, kind: output, shape index: {}]  }
   0x1   :  { %9 = vsyncpa [#allocation4 + $0x1], 0  ;;  %s617_s9 = smov 0   ;;  %s619_s10 = smov 0  }
   0x2   :  { %s621_s11 = smov 0   ;;  %s623_s12 = smov 0  }
   0x3   :  { %s625_s13 = smov 0   ;;  %s627_s14 = smov 0  }
   0x4 LB: > { %s427_s15 = sadd.s32 4294967295, %s595_s14   ;;  %s428_s16 = sadd.s32 4294967294, %s595_s14   ;;  %s595_s14 = sphi %s627_s14, %s15_s14   ;;  %s591_s13 = sphi %s625_s13, %s748_s13   ;;  %s587_s12 = sphi %s623_s12, %s747_s12   ;;  %s583_s11 = sphi %s621_s11, %s746_s11   ;;  %s579_s10 = sphi %s619_s10, %s745_s10   ;;  %s575_s9 = sphi %s617_s9, %s744_s9  }
   0x5   : > { %s27_s17 = sadd.s32 1, %s591_s13  ;;  %s85_s18 = sadd.s32 1, %s583_s11 }
   0x6   : > { %p29_p0 = scmp.ge.s32.totalorder %s27_s17, 2  ;;  %p95_p1 = scmp.ne.s32.totalorder %s583_s11, %s579_s10 }
   0x7   : > { %p96_p2 = scmp.eq.s32.totalorder %s427_s15, 1  ;;  %p101_p3 = scmp.ne.s32.totalorder %s579_s10, %s575_s9 }
   0x8   : > { %s750_s17 = smov (%p29_p0, %s27_s17), 0  ;;  %p102_p5 = scmp.eq.s32.totalorder %s428_s16, 1 }
   0x9   : > { %p657_p4 = por %p96_p2, %p95_p1  ;;  %s80_s20 = ssub.s32 %s591_s13, %s750_s17 }
   0xa   : > { %p431_p6 = scmp.ge.s32.totalorder %s595_s14, 1  ;;  %p83_p7 = scmp.eq.s32.totalorder %s80_s20, 0 }
   0xb   : > { %p664_p8 = por %p102_p5, %p101_p3  ;;  %p133_p9 = scmp.lt.s32.totalorder %s595_s14, 3 }
   0xc   : > { %s670_s22 = scalar_select %p83_p7, %s583_s11, %s85_s18  }
   0xd   : > { %p134_p10 = pnand %p431_p6, %p133_p9 }
   0xe   : > { %p157_p11 = scmp.lt.s32.totalorder (!%p134_p10), %s587_s12, 1  ;;  %vm168_vm0 = vcmask (!%p134_p10), 3072   ;;  %v597_v0 = vmov (!%p134_p10), 0.0   ;;  %vm598_vm1 = vmmov (!%p134_p10), 0   ;;  %vm190_vm2 = vcmask (!%p134_p10), 1043456   ;;  %v434_v1 = vld [vmem:[%s740_s1 + $0x8] sm:$0xff] (!%p134_p10) }
   0xf   : > { %137 = sbr.rel (%p134_p10) target bundleno = 372 (0x174), region = 28  ;;  %169 = vst.msk [vmem:[#allocation2] sm:$0xf] (!%p134_p10), %vm168_vm0, %v597_v0  ;;  %452 = vmatprep.subr.mxu0 (!%p134_p10), %v597_v0  ;;  %447 = vmatprep.subr.mxu1 (!%p134_p10), %v597_v0  ;;  %vm186_vm3 = vcmask (!%p134_p10), 31744   ;;  %s599_s30 = smov (!%p134_p10), 1   ;;  %vm181_vm4 = vcmask (!%p134_p10), 7168  }
  0x10   : > { %454 = vmatprep.mubr.msk.f32.mxu0 (!%p134_p10), %vm598_vm1, %v597_v0  ;;  %449 = vmatprep.mubr.msk.f32.mxu1 (!%p134_p10), %vm598_vm1, %v597_v0  ;;  %s600_s3 = smov (!%p134_p10), 113   ;;  %v185_v5 = vld [vmem:[%s740_s1] sm:$0xff] (!%p134_p10)  ;;  %s154_s6 = sand.u32 (!%p134_p10), 1, %s579_s10   ;;  %vm339_vm5 = vcmask (!%p134_p10), 130048  }
  0x11   : > { %s432_s7 = sshll.u32 (!%p134_p10), %s154_s6, 3  ;;  %s440_s8 = sshll.u32 (!%p134_p10), %s587_s12, 7 }
  0x12   : > { %s156_s15 = scalar_lea.vmem (!%p134_p10), [#allocation3], %s432_s7 }
  0x13   : > { %s356_s16 = sshll.u32 (!%p134_p10), %s156_s15, 4  ;;  %s694_s16 = int_to_ptr.vmem [resolvable:$true] %s356_s16 }
  0x14   : > { %s517_s25 = scalar_lea.vmem (!%p134_p10), %s694_s16, 128 }
  0x15   : > { %p518_p12 = scmp.ne.s32.totalorder (!%p134_p10), %s694_s16, %s517_s25 }
  0x16   : > { %s158_s23 = scalar_select %p157_p11, %s587_s12, 1  ;;  %v171_v3 = vld [vmem:[#allocation2] sm:$0xf] }
  0x17   : > { %p519_p13 = pnand %p518_p12, %p657_p4  ;;  %s601_s12 = smov [#allocation3]  }
  0x18   : > { %s433_s24 = sshll.u32 %s158_s23, 2  ;;  %s692_s23 = scalar_lea.hbm %s741_s2, %s440_s8 }
  0x19   : > { %s163_s27 = scalar_lea.vmem %s739_s0, %s433_s24  ;;  %s342_s24 = scalar_lea.sflag [#allocation4], %s154_s6 }
  0x1a   : > { %v170_v2 = vld [vmem:[%s163_s27] sm:$0xf]  ;;  %p520_p0 = pneg %p519_p13  ;;  %s521_s26 = sshll.u32 %s601_s12, 4  ;;  %s522_s26 = int_to_ptr.vmem [resolvable:$false] %s521_s26 }
  0x1b   : > { %178 = vrot.lane.b32.xlu0 %v170_v2, %s599_s30  ;;  %453 = vmatpush3.msk.msra.mxu0 %vm190_vm2, %v170_v2  ;;  %s523_s27 = scalar_lea.vmem %s522_s26, 256  ;;  %p524_p1 = scmp.lt.s32.totalorder %s694_s16, %s522_s26 }
  0x1c   : > { %455 = vmatmul.mubr.msk.f32.vlgmr.msra.gmra.mrb[0].mxu0 %vm186_vm3, %v434_v1  ;;  %p525_p2 = scmp.lt.s32.totalorder %s523_s27, %s517_s25 }
  0x1e   : > { %p526_p3 = por %p525_p2, %p524_p1 }
  0x1f   : > { %173 = vrot.lane.b32.xlu0 %v170_v2, %s600_s3 }
  0x20   : > { %p527_p5 = pnand %p526_p3, %p520_p0 }
  0x8d   : > { %v179_v4 = vpop.permute.xlu0 %178 }
  0x8e   : > { %v182_v6 = vsel %vm181_vm4, %v171_v3, %v179_v4 }
  0x8f   : > { %448 = vmatpush3.msk.msra.mxu1 %vm190_vm2, %v182_v6 }
  0x90   : > { %450 = vmatmul.mubr.msk.f32.vlgmr.msra.gmra.mrb[0].mxu1 %vm186_vm3, %v185_v5 }
  0x91   : > { %v174_v7 = vpop.permute.xlu0 %173 }
  0x92   : > { %177 = vst.msk [vmem:[#allocation2] sm:$0xf] %vm168_vm0, %v174_v7 }
  0xef   : > { %v335_v8 = vpop.f32.mrb[0].mxu0 }
  0xf0   : > { %v456_v9 = vpop.f32.mrb[1].mxu0 }
 0x163   : > { %v260_v10 = vpop.f32.mrb[0].mxu1 }
 0x164   : > { %v336_v11 = vadd.f32 %v335_v8, %v260_v10  ;;  %v451_v12 = vpop.f32.mrb[1].mxu1 }
 0x166   : > { %340 = vst.msk [vmem:[%s156_s15] sm:$0xff] %vm339_vm5, %v336_v11 }
 0x167   : > { %530 = shalt.err (!%p527_p5)
}
 0x168   : > { %s531_s28 = scalar_lea.hbm %s692_s23, 128  ;;  %s535_s3 = scalar_lea.hbm %s741_s2, 256 }
 0x169   : > { %p532_p6 = scmp.ne.s32.totalorder %s692_s23, %s531_s28  ;;  %p536_p10 = scmp.lt.u32.totalorder %s692_s23, %s741_s2 }
 0x16a   : > { %p537_p11 = scmp.lt.u32.totalorder %s535_s3, %s531_s28  ;;  %p539_p13 = scmp.lt.u32.totalorder %s531_s28, %s692_s23 }
 0x16b   : > { %p533_p7 = pnand %p532_p6, %p657_p4 }
 0x16c   : > { %p538_p12 = por %p537_p11, %p536_p10 }
 0x16d   : > { %p534_p9 = pneg %p533_p7 }
 0x16e   : > { %p540_p0 = por %p539_p13, %p538_p12 }
 0x170   : > { %p541_p1 = pnand %p540_p0, %p534_p9 }
 0x172   : > { %544 = shalt.err (!%p541_p1)
}
 0x173   : > { %458 = dma.vmem_to_hbm [thread:$0]  (%p657_p4), %s694_s16, 128, %s692_s23, %s342_s24  }
 0x174 PF: > { %p464_p2 = scmp.ge.s32.totalorder %s595_s14, 2  ;;  %s368_s6 = sand.u32 1, %s575_s9  }
 0x175   : > { %s369_s7 = scalar_lea.sflag [#allocation4], %s368_s6 }
 0x176   : > { %p461_p3 = pnand %p464_p2, %p664_p8 }
 0x178   : > { %570 = dma.done.wait (!%p461_p3), %s369_s7, 128  }
 0x179   : > { %572 = vsyncadd (!%p461_p3), %s369_s7, 4294967168  ;;  %s15_s14 = sadd.s32 1, %s595_s14   ;;  %s744_s9 = smov %s579_s10 }
 0x17a   : > { %p12_p5 = scmp.ge.s32.totalorder %s15_s14, 4   ;;  %s745_s10 = smov %s583_s11 }
 0x17b   : > { %s746_s11 = smov %s670_s22  ;;  %s747_s12 = smov %s591_s13 }
 0x17c   : > { %s748_s13 = smov %s750_s17  ;;  %14 = sbr.rel (!%p12_p5) target bundleno = 4 (0x4), region = 68 }
 0x183   :  { %374 = vsyncpa [#allocation4], 1 }
 0x184   :  { %376 = vsyncpa [#allocation4 + $0x1], 1 }

</bundles_post_ra>
